<compile_context>
chip_gen: v5e
topology: v5e:2x2
jax: 0.10.0
libtpu: 0.0.40
codegen_flags: <defaults>
</compile_context>

<pallas_src>
import functools

import jax
import jax.numpy as jnp
from jax import lax
from jax.experimental import pallas as pl
from jax.experimental.pallas import tpu as pltpu


# ----------------------------------------------------------------------------
# Kernel 1: backbone stand-in conv, fused bias and /100.
#   w: (2, K) bf16, b: (2, 1) f32, patches: (K, P_tile) bf16 -> out (2, P_tile)
#   Lane axis is the big P axis (no masked vst), weights resident across grid.
# ----------------------------------------------------------------------------
def flow_conv_kernel(w_ref, b_ref, p_ref, o_ref):
    acc = jnp.dot(w_ref[...], p_ref[...], preferred_element_type=jnp.float32)
    o_ref[...] = (acc + b_ref[...]) * jnp.float32(0.01)      # senet(x) / 100


# ----------------------------------------------------------------------------
# Kernel 2: bilinear upsample (align_corners=True), per block of Bt maps:
#   stage 1: one batched matmul (Bt*hf, wf) @ (wf, W)
#   stage 2: per-map Ry (H, hf) @ (hf, W)
# ----------------------------------------------------------------------------
def upsample_kernel(f_ref, ry_ref, rxT_ref, o_ref):
    Bt, hf, wf = f_ref.shape
    W = rxT_ref.shape[1]
    t = jnp.dot(f_ref[...].reshape(Bt * hf, wf), rxT_ref[...],
                preferred_element_type=jnp.float32)           # (Bt*hf, W)
    t = t.reshape(Bt, hf, W).astype(jnp.bfloat16)
    ry = ry_ref[...]
    for b in range(Bt):                                        # small static loop
        o_ref[b] = jnp.dot(ry, t[b], preferred_element_type=jnp.float32)


# ----------------------------------------------------------------------------
# Kernel 3: flow_warp == F.grid_sample(x, base_grid + flow, 'bilinear',
#           padding_mode='border', align_corners=False).
# Grid = (N, pixel tiles of T output pixels).  The full (C,H,W) image stays
# resident in VMEM across the tile axis; per tile we build per-pixel separable
# one-hot interpolation matrices Cx^T (W,T) and Ry^T (H,T) and contract.
# ----------------------------------------------------------------------------
def warp_kernel(x_ref, flow_ref, out_ref, *, H, W, T):
    # x_ref: (1, C, H, W) bf16, flow_ref: (1, 2, T) f32, out_ref: (1, C, T) f32
    C = x_ref.shape[1]
    f32 = jnp.float32

    # flat output-pixel ids of this tile
    t0 = pl.program_id(1) * T
    p = (t0 + lax.broadcasted_iota(jnp.int32, (1, T), 1)).astype(f32)
    # exact row/col decomposition without integer div (valid for HW < 2**24)
    iy_id = jnp.floor((p + 0.5) / f32(W))                      # output row
    jx_id = p - iy_id * f32(W)                                 # output col

    fl_x = flow_ref[0, 0:1, :]                                 # (1, T)
    fl_y = flow_ref[0, 1:2, :]

    # base grid in [-1, 1] (same construction as flow_warp) + upsampled flow
    gx = 2.0 * jx_id / f32(max(W - 1, 1)) - 1.0 + fl_x
    gy = 2.0 * iy_id / f32(max(H - 1, 1)) - 1.0 + fl_y

    # grid_sample unnormalize (align_corners=False), border padding -> clip
    ix = jnp.clip(((gx + 1.0) * f32(W) - 1.0) * 0.5, 0.0, f32(W - 1))
    iy = jnp.clip(((gy + 1.0) * f32(H) - 1.0) * 0.5, 0.0, f32(H - 1))

    x0f = jnp.floor(ix)
    y0f = jnp.floor(iy)
    fx = ix - x0f
    fy = iy - y0f
    x0 = x0f.astype(jnp.int32)
    y0 = y0f.astype(jnp.int32)
    x1 = jnp.minimum(x0 + 1, W - 1)
    y1 = jnp.minimum(y0 + 1, H - 1)

    # separable per-pixel interpolation weights (duplicated corners sum to 1)
    qx = lax.broadcasted_iota(jnp.int32, (W, T), 0)            # source column
    cxT = (jnp.where(qx == x0, 1.0 - fx, 0.0)
           + jnp.where(qx == x1, fx, 0.0)).astype(jnp.bfloat16)   # (W, T)
    qy = lax.broadcasted_iota(jnp.int32, (H, T), 0)            # source row
    ryT = (jnp.where(qy == y0, 1.0 - fy, 0.0)
           + jnp.where(qy == y1, fy, 0.0))                        # (H, T) f32

    outs = []
    for c in range(C):                                         # small static loop
        g = jnp.dot(x_ref[0, c], cxT,
                    preferred_element_type=jnp.float32)        # (H, T)  [MXU]
        outs.append(jnp.sum(g * ryT, axis=0, keepdims=True))   # (1, T)  [VPU/XLU]
    out_ref[0] = jnp.concatenate(outs, axis=0).astype(out_ref.dtype)


# ----------------------------------------------------------------------------
# Glue (plain JAX): parameter reshapes, im2col, resize matrices
# ----------------------------------------------------------------------------
def bilinear_matrix(out_size, in_size):
    """Row-interpolation matrix for align_corners=True bilinear resize."""
    if out_size == 1:
        src = jnp.zeros((1,), jnp.float32)
    else:
        src = (jnp.arange(out_size, dtype=jnp.float32)
               * (in_size - 1) / max(out_size - 1, 1))
    x0 = jnp.clip(jnp.floor(src).astype(jnp.int32), 0, in_size - 1)
    x1 = jnp.minimum(x0 + 1, in_size - 1)
    w1 = src - x0.astype(jnp.float32)
    w0 = 1.0 - w1
    rows = jnp.arange(out_size)
    r = jnp.zeros((out_size, in_size), jnp.float32)
    r = r.at[rows, x0].add(w0)
    r = r.at[rows, x1].add(w1)
    return r


def autotoon_forward(x, conv_w, conv_b):
    """x: (N, C, H, W) float32 (NCHW).  Returns (warped, flow_norm, flow)."""
    N, C, H, W = x.shape
    Oc, Ci, kh, kw = conv_w.shape
    assert Ci == C and Oc == 2
    hf, wf = H // kh, W // kw
    K = C * kh * kw
    P = N * hf * wf
    vmem = 32 * 1024 * 1024   # raise scoped VMEM (v5e default is only 16 MiB)

    # --- flow = backbone(x) / 100  (stride == kernel conv as matmul) ---------
    # patches laid out (K, P): big dim on lanes; lane-dense (2, P) output.
    patches = (x.reshape(N, C, hf, kh, wf, kw)
                 .transpose(1, 3, 5, 0, 2, 4)
                 .reshape(K, P)).astype(jnp.bfloat16)
    wmat = conv_w.reshape(Oc, K).astype(jnp.bfloat16)           # (2, K)
    bias = conv_b.reshape(Oc, 1).astype(jnp.float32)            # (2, 1)

    Pt = P if P <= 1024 else 1024
    flow_2p = pl.pallas_call(
        flow_conv_kernel,
        out_shape=jax.ShapeDtypeStruct((Oc, P), jnp.float32),
        grid=(pl.cdiv(P, Pt),),
        in_specs=[pl.BlockSpec((Oc, K), lambda i: (0, 0)),
                  pl.BlockSpec((Oc, 1), lambda i: (0, 0)),
                  pl.BlockSpec((K, Pt), lambda i: (0, i))],
        out_specs=pl.BlockSpec((Oc, Pt), lambda i: (0, i)),
        compiler_params=pltpu.CompilerParams(
            dimension_semantics=("parallel",), vmem_limit_bytes=vmem),
    )(wmat, bias, patches)
    flow = flow_2p.reshape(Oc, N, hf, wf).transpose(1, 0, 2, 3)  # (N, 2, hf, wf)

    # --- flow_norm = UpsamplingBilinear2d(size=H)(flow) (align_corners=True) -
    ry = bilinear_matrix(H, hf).astype(jnp.bfloat16)             # (H, hf)
    rxT = bilinear_matrix(W, wf).T.astype(jnp.bfloat16)          # (wf, W)
    B = N * Oc
    f_small = flow.reshape(B, hf, wf).astype(jnp.bfloat16)
    Bt = B if B <= 8 else 8
    flow_up = pl.pallas_call(
        upsample_kernel,
        out_shape=jax.ShapeDtypeStruct((B, H, W), jnp.float32),
        grid=(pl.cdiv(B, Bt),),
        in_specs=[pl.BlockSpec((Bt, hf, wf), lambda b: (b, 0, 0)),
                  pl.BlockSpec((H, hf), lambda b: (0, 0)),
                  pl.BlockSpec((wf, W), lambda b: (0, 0))],
        out_specs=pl.BlockSpec((Bt, H, W), lambda b: (b, 0, 0)),
        compiler_params=pltpu.CompilerParams(
            dimension_semantics=("parallel",), vmem_limit_bytes=vmem),
    )(f_small, ry, rxT)
    flow_norm = flow_up.reshape(N, Oc, H, W)

    # --- warped = flow_warp(x, flow_norm)  (grid_sample, border padding) -----
    HW = H * W
    T = HW if HW <= 512 else 512            # output-pixel tile (multiple of 128)
    x_bf = x.astype(jnp.bfloat16)
    flow_flat = flow_norm.reshape(N, 2, HW)
    warped_flat = pl.pallas_call(
        functools.partial(warp_kernel, H=H, W=W, T=T),
        out_shape=jax.ShapeDtypeStruct((N, C, HW), jnp.float32),
        grid=(N, pl.cdiv(HW, T)),
        in_specs=[pl.BlockSpec((1, C, H, W), lambda n, t: (n, 0, 0, 0)),
                  pl.BlockSpec((1, 2, T), lambda n, t: (n, 0, t))],
        out_specs=pl.BlockSpec((1, C, T), lambda n, t: (n, 0, t)),
        compiler_params=pltpu.CompilerParams(
            dimension_semantics=("parallel", "arbitrary"),
            vmem_limit_bytes=vmem),
    )(x_bf, flow_flat)
    warped = warped_flat.reshape(N, C, H, W)

    return warped, flow_norm, flow


if __name__ == "__main__":
    key = jax.random.PRNGKey(0)
    N, C, H, W = 2, 3, 16, 16          # small stand-in for (N, 3, 256, 256)
    k = 4                               # backbone stand-in: conv 4x4 stride 4
    k_x, k_w = jax.random.split(key)

    x = jax.random.normal(k_x, (N, C, H, W), dtype=jnp.float32)
    # kaiming_normal_(fan_in) init for the stand-in conv, bias = 0
    fan_in = C * k * k
    conv_w = (jax.random.normal(k_w, (2, C, k, k), dtype=jnp.float32)
              * jnp.sqrt(2.0 / fan_in))
    conv_b = jnp.zeros((2,), dtype=jnp.float32)

    fwd = jax.jit(autotoon_forward)
    warped, flow_norm, flow = fwd(x, conv_w, conv_b)
    jax.block_until_ready((warped, flow_norm, flow))

    assert warped.shape == (N, C, H, W)
    assert flow_norm.shape == (N, 2, H, W)
    assert flow.shape == (N, 2, H // k, W // k)
    assert bool(jnp.isfinite(warped).all())
    assert bool(jnp.isfinite(flow_norm).all())
    print("KERNEL_OK")
</pallas_src>

<mosaic_0001>
module attributes {stable_mosaic.version = 11 : i64} {
  func.func @upsample_kernel(%arg0: i32, %arg1: memref<4x4x4xbf16, #tpu.memory_space<vmem>>, %arg2: memref<16x4xbf16, #tpu.memory_space<vmem>>, %arg3: memref<4x16xbf16, #tpu.memory_space<vmem>>, %arg4: memref<4x16x16xf32, #tpu.memory_space<vmem>>) attributes {dimension_semantics = [#tpu.dimension_semantics<parallel>], iteration_bounds = array<i64: 1>, scalar_prefetch = 0 : i64, scratch_operands = 0 : i64, tpu.core_type = #tpu.core_type<tc>, window_params = [{transform_indices = @transform_0, window_bounds = array<i64: 4, 4, 4>}, {pipeline_mode = #tpu.pipeline_mode<synchronous>, transform_indices = @transform_1, window_bounds = array<i64: 16, 4>}, {pipeline_mode = #tpu.pipeline_mode<synchronous>, transform_indices = @transform_2, window_bounds = array<i64: 4, 16>}, {transform_indices = @transform_3, window_bounds = array<i64: 4, 16, 16>}]} {
    %c0 = arith.constant 0 : index
    %c0_0 = arith.constant 0 : index
    %c0_1 = arith.constant 0 : index
    %0 = vector.load %arg1[%c0, %c0_0, %c0_1] : memref<4x4x4xbf16, #tpu.memory_space<vmem>>, vector<4x4x4xbf16>
    %1 = vector.shape_cast %0 : vector<4x4x4xbf16> to vector<16x4xbf16>
    %c0_2 = arith.constant 0 : index
    %c0_3 = arith.constant 0 : index
    %2 = vector.load %arg3[%c0_2, %c0_3] : memref<4x16xbf16, #tpu.memory_space<vmem>>, vector<4x16xbf16>
    %cst = arith.constant dense<0.000000e+00> : vector<16x16xf32>
    %3 = tpu.matmul %1, %2, %cst {dimension_numbers = #tpu.dot_dimension_numbers<[1], [0], [0], [1], [0, 0, 1, 1], [], []>} : vector<16x4xbf16>, vector<4x16xbf16>, vector<16x16xf32> -> vector<16x16xf32>
    %4 = vector.shape_cast %3 : vector<16x16xf32> to vector<4x4x16xf32>
    %5 = arith.truncf %4 : vector<4x4x16xf32> to vector<4x4x16xbf16>
    %c0_4 = arith.constant 0 : index
    %c0_5 = arith.constant 0 : index
    %6 = vector.load %arg2[%c0_4, %c0_5] : memref<16x4xbf16, #tpu.memory_space<vmem>>, vector<16x4xbf16>
    %7 = vector.extract_strided_slice %5 {offsets = [0, 0, 0], sizes = [1, 4, 16], strides = [1, 1, 1]} : vector<4x4x16xbf16> to vector<1x4x16xbf16>
    %8 = vector.shape_cast %7 : vector<1x4x16xbf16> to vector<4x16xbf16>
    %cst_6 = arith.constant dense<0.000000e+00> : vector<16x16xf32>
    %9 = tpu.matmul %6, %8, %cst_6 {dimension_numbers = #tpu.dot_dimension_numbers<[1], [0], [0], [1], [0, 0, 1, 1], [], []>} : vector<16x4xbf16>, vector<4x16xbf16>, vector<16x16xf32> -> vector<16x16xf32>
    %c0_7 = arith.constant 0 : index
    %c0_8 = arith.constant 0 : index
    %c0_9 = arith.constant 0 : index
    %10 = vector.load %arg4[%c0_7, %c0_8, %c0_9] : memref<4x16x16xf32, #tpu.memory_space<vmem>>, vector<1x16x16xf32>
    %11 = vector.shape_cast %10 : vector<1x16x16xf32> to vector<16x16xf32>
    %12 = vector.shape_cast %9 : vector<16x16xf32> to vector<1x16x16xf32>
    tpu.vector_store %arg4[%c0_7, %c0_8, %c0_9], %12 {strides = array<i32>} : memref<4x16x16xf32, #tpu.memory_space<vmem>>, vector<1x16x16xf32>,
    %13 = vector.extract_strided_slice %5 {offsets = [1, 0, 0], sizes = [1, 4, 16], strides = [1, 1, 1]} : vector<4x4x16xbf16> to vector<1x4x16xbf16>
    %14 = vector.shape_cast %13 : vector<1x4x16xbf16> to vector<4x16xbf16>
    %cst_10 = arith.constant dense<0.000000e+00> : vector<16x16xf32>
    %15 = tpu.matmul %6, %14, %cst_10 {dimension_numbers = #tpu.dot_dimension_numbers<[1], [0], [0], [1], [0, 0, 1, 1], [], []>} : vector<16x4xbf16>, vector<4x16xbf16>, vector<16x16xf32> -> vector<16x16xf32>
    %c1 = arith.constant 1 : index
    %c0_11 = arith.constant 0 : index
    %c0_12 = arith.constant 0 : index
    %16 = vector.load %arg4[%c1, %c0_11, %c0_12] : memref<4x16x16xf32, #tpu.memory_space<vmem>>, vector<1x16x16xf32>
    %17 = vector.shape_cast %16 : vector<1x16x16xf32> to vector<16x16xf32>
    %18 = vector.shape_cast %15 : vector<16x16xf32> to vector<1x16x16xf32>
    tpu.vector_store %arg4[%c1, %c0_11, %c0_12], %18 {strides = array<i32>} : memref<4x16x16xf32, #tpu.memory_space<vmem>>, vector<1x16x16xf32>,
    %19 = vector.extract_strided_slice %5 {offsets = [2, 0, 0], sizes = [1, 4, 16], strides = [1, 1, 1]} : vector<4x4x16xbf16> to vector<1x4x16xbf16>
    %20 = vector.shape_cast %19 : vector<1x4x16xbf16> to vector<4x16xbf16>
    %cst_13 = arith.constant dense<0.000000e+00> : vector<16x16xf32>
    %21 = tpu.matmul %6, %20, %cst_13 {dimension_numbers = #tpu.dot_dimension_numbers<[1], [0], [0], [1], [0, 0, 1, 1], [], []>} : vector<16x4xbf16>, vector<4x16xbf16>, vector<16x16xf32> -> vector<16x16xf32>
    %c2 = arith.constant 2 : index
    %c0_14 = arith.constant 0 : index
    %c0_15 = arith.constant 0 : index
    %22 = vector.load %arg4[%c2, %c0_14, %c0_15] : memref<4x16x16xf32, #tpu.memory_space<vmem>>, vector<1x16x16xf32>
    %23 = vector.shape_cast %22 : vector<1x16x16xf32> to vector<16x16xf32>
    %24 = vector.shape_cast %21 : vector<16x16xf32> to vector<1x16x16xf32>
    tpu.vector_store %arg4[%c2, %c0_14, %c0_15], %24 {strides = array<i32>} : memref<4x16x16xf32, #tpu.memory_space<vmem>>, vector<1x16x16xf32>,
    %25 = vector.extract_strided_slice %5 {offsets = [3, 0, 0], sizes = [1, 4, 16], strides = [1, 1, 1]} : vector<4x4x16xbf16> to vector<1x4x16xbf16>
    %26 = vector.shape_cast %25 : vector<1x4x16xbf16> to vector<4x16xbf16>
    %cst_16 = arith.constant dense<0.000000e+00> : vector<16x16xf32>
    %27 = tpu.matmul %6, %26, %cst_16 {dimension_numbers = #tpu.dot_dimension_numbers<[1], [0], [0], [1], [0, 0, 1, 1], [], []>} : vector<16x4xbf16>, vector<4x16xbf16>, vector<16x16xf32> -> vector<16x16xf32>
    %c3 = arith.constant 3 : index
    %c0_17 = arith.constant 0 : index
    %c0_18 = arith.constant 0 : index
    %28 = vector.load %arg4[%c3, %c0_17, %c0_18] : memref<4x16x16xf32, #tpu.memory_space<vmem>>, vector<1x16x16xf32>
    %29 = vector.shape_cast %28 : vector<1x16x16xf32> to vector<16x16xf32>
    %30 = vector.shape_cast %27 : vector<16x16xf32> to vector<1x16x16xf32>
    tpu.vector_store %arg4[%c3, %c0_17, %c0_18], %30 {strides = array<i32>} : memref<4x16x16xf32, #tpu.memory_space<vmem>>, vector<1x16x16xf32>,
    return
  }
  func.func @transform_0(%arg0: i32) -> (i32, i32, i32) {
    %c0_i32 = arith.constant 0 : i32
    %c0_i32_0 = arith.constant 0 : i32
    %c0_i32_1 = arith.constant 0 : i32
    return %arg0, %c0_i32, %c0_i32_0 : i32, i32, i32
  }
  func.func @transform_1(%arg0: i32) -> (i32, i32) {
    %c0_i32 = arith.constant 0 : i32
    %c0_i32_0 = arith.constant 0 : i32
    %c0_i32_1 = arith.constant 0 : i32
    return %c0_i32, %c0_i32_0 : i32, i32
  }
  func.func @transform_2(%arg0: i32) -> (i32, i32) {
    %c0_i32 = arith.constant 0 : i32
    %c0_i32_0 = arith.constant 0 : i32
    %c0_i32_1 = arith.constant 0 : i32
    return %c0_i32, %c0_i32_0 : i32, i32
  }
  func.func @transform_3(%arg0: i32) -> (i32, i32, i32) {
    %c0_i32 = arith.constant 0 : i32
    %c0_i32_0 = arith.constant 0 : i32
    %c0_i32_1 = arith.constant 0 : i32
    return %arg0, %c0_i32, %c0_i32_0 : i32, i32, i32
  }
}

module attributes {stable_mosaic.version = 11 : i64} {
  func.func @flow_conv_kernel(%arg0: i32, %arg1: memref<2x48xbf16, #tpu.memory_space<vmem>>, %arg2: memref<2x1xf32, #tpu.memory_space<vmem>>, %arg3: memref<48x32xbf16, #tpu.memory_space<vmem>>, %arg4: memref<2x32xf32, #tpu.memory_space<vmem>>) attributes {dimension_semantics = [#tpu.dimension_semantics<parallel>], iteration_bounds = array<i64: 1>, scalar_prefetch = 0 : i64, scratch_operands = 0 : i64, tpu.core_type = #tpu.core_type<tc>, window_params = [{pipeline_mode = #tpu.pipeline_mode<synchronous>, transform_indices = @transform_0, window_bounds = array<i64: 2, 48>}, {pipeline_mode = #tpu.pipeline_mode<synchronous>, transform_indices = @transform_1, window_bounds = array<i64: 2, 1>}, {transform_indices = @transform_2, window_bounds = array<i64: 48, 32>}, {transform_indices = @transform_3, window_bounds = array<i64: 2, 32>}]} {
    %c0 = arith.constant 0 : index
    %c0_0 = arith.constant 0 : index
    %0 = vector.load %arg1[%c0, %c0_0] : memref<2x48xbf16, #tpu.memory_space<vmem>>, vector<2x48xbf16>
    %c0_1 = arith.constant 0 : index
    %c0_2 = arith.constant 0 : index
    %1 = vector.load %arg3[%c0_1, %c0_2] : memref<48x32xbf16, #tpu.memory_space<vmem>>, vector<48x32xbf16>
    %cst = arith.constant dense<0.000000e+00> : vector<2x32xf32>
    %2 = tpu.matmul %0, %1, %cst {dimension_numbers = #tpu.dot_dimension_numbers<[1], [0], [0], [1], [0, 0, 1, 1], [], []>} : vector<2x48xbf16>, vector<48x32xbf16>, vector<2x32xf32> -> vector<2x32xf32>
    %c0_3 = arith.constant 0 : index
    %c0_4 = arith.constant 0 : index
    %3 = vector.load %arg2[%c0_3, %c0_4] : memref<2x1xf32, #tpu.memory_space<vmem>>, vector<2x1xf32>
    %4 = vector.broadcast %3 : vector<2x1xf32> to vector<2x32xf32>
    %5 = arith.addf %2, %4 : vector<2x32xf32>
    %cst_5 = arith.constant 0.00999999977 : f32
    %6 = vector.broadcast %cst_5 : f32 to vector<2x32xf32>
    %7 = arith.mulf %5, %6 : vector<2x32xf32>
    %c0_6 = arith.constant 0 : index
    %c0_7 = arith.constant 0 : index
    %8 = vector.load %arg4[%c0_6, %c0_7] : memref<2x32xf32, #tpu.memory_space<vmem>>, vector<2x32xf32>
    tpu.vector_store %arg4[%c0_6, %c0_7], %7 {strides = array<i32>} : memref<2x32xf32, #tpu.memory_space<vmem>>, vector<2x32xf32>,
    return
  }
  func.func @transform_0(%arg0: i32) -> (i32, i32) {
    %c0_i32 = arith.constant 0 : i32
    %c0_i32_0 = arith.constant 0 : i32
    %c0_i32_1 = arith.constant 0 : i32
    return %c0_i32, %c0_i32_0 : i32, i32
  }
  func.func @transform_1(%arg0: i32) -> (i32, i32) {
    %c0_i32 = arith.constant 0 : i32
    %c0_i32_0 = arith.constant 0 : i32
    %c0_i32_1 = arith.constant 0 : i32
    return %c0_i32, %c0_i32_0 : i32, i32
  }
  func.func @transform_2(%arg0: i32) -> (i32, i32) {
    %c0_i32 = arith.constant 0 : i32
    %c0_i32_0 = arith.constant 0 : i32
    return %c0_i32, %arg0 : i32, i32
  }
  func.func @transform_3(%arg0: i32) -> (i32, i32) {
    %c0_i32 = arith.constant 0 : i32
    %c0_i32_0 = arith.constant 0 : i32
    return %c0_i32, %arg0 : i32, i32
  }
}

module attributes {stable_mosaic.version = 11 : i64} {
  func.func @warp_kernel(%arg0: i32, %arg1: i32, %arg2: memref<1x3x16x16xbf16, #tpu.memory_space<vmem>>, %arg3: memref<1x2x256xf32, #tpu.memory_space<vmem>>, %arg4: memref<1x3x256xf32, #tpu.memory_space<vmem>>) attributes {dimension_semantics = [#tpu.dimension_semantics<parallel>, #tpu.dimension_semantics<arbitrary>], iteration_bounds = array<i64: 2, 1>, scalar_prefetch = 0 : i64, scratch_operands = 0 : i64, tpu.core_type = #tpu.core_type<tc>, window_params = [{transform_indices = @transform_0, window_bounds = array<i64: 1, 3, 16, 16>}, {transform_indices = @transform_1, window_bounds = array<i64: 1, 2, 256>}, {transform_indices = @transform_2, window_bounds = array<i64: 1, 3, 256>}]} {
    %c256_i32 = arith.constant 256 : i32
    %0 = arith.muli %arg1, %c256_i32 : i32
    %1 = tpu.iota {dimensions = array<i32: 1>} : vector<1x256xi32>
    %2 = vector.broadcast %0 : i32 to vector<1x256xi32>
    %3 = arith.addi %2, %1 : vector<1x256xi32>
    %4 = arith.sitofp %3 : vector<1x256xi32> to vector<1x256xf32>
    %cst = arith.constant 5.000000e-01 : f32
    %5 = vector.broadcast %cst : f32 to vector<1x256xf32>
    %6 = arith.addf %4, %5 : vector<1x256xf32>
    %cst_0 = arith.constant 1.600000e+01 : f32
    %7 = vector.broadcast %cst_0 : f32 to vector<1x256xf32>
    %8 = arith.divf %6, %7 : vector<1x256xf32>
    %9 = math.floor %8 : vector<1x256xf32>
    %cst_1 = arith.constant 1.600000e+01 : f32
    %10 = vector.broadcast %cst_1 : f32 to vector<1x256xf32>
    %11 = arith.mulf %9, %10 : vector<1x256xf32>
    %12 = arith.subf %4, %11 : vector<1x256xf32>
    %c0 = arith.constant 0 : index
    %c0_2 = arith.constant 0 : index
    %c0_3 = arith.constant 0 : index
    %13 = vector.load %arg3[%c0, %c0_2, %c0_3] : memref<1x2x256xf32, #tpu.memory_space<vmem>>, vector<1x1x256xf32>
    %14 = vector.shape_cast %13 : vector<1x1x256xf32> to vector<1x256xf32>
    %c0_4 = arith.constant 0 : index
    %c1 = arith.constant 1 : index
    %c0_5 = arith.constant 0 : index
    %15 = vector.load %arg3[%c0_4, %c1, %c0_5] : memref<1x2x256xf32, #tpu.memory_space<vmem>>, vector<1x1x256xf32>
    %16 = vector.shape_cast %15 : vector<1x1x256xf32> to vector<1x256xf32>
    %cst_6 = arith.constant 2.000000e+00 : f32
    %17 = vector.broadcast %cst_6 : f32 to vector<1x256xf32>
    %18 = arith.mulf %17, %12 : vector<1x256xf32>
    %cst_7 = arith.constant 1.500000e+01 : f32
    %19 = vector.broadcast %cst_7 : f32 to vector<1x256xf32>
    %20 = arith.divf %18, %19 : vector<1x256xf32>
    %cst_8 = arith.constant 1.000000e+00 : f32
    %21 = vector.broadcast %cst_8 : f32 to vector<1x256xf32>
    %22 = arith.subf %20, %21 : vector<1x256xf32>
    %23 = arith.addf %22, %14 : vector<1x256xf32>
    %cst_9 = arith.constant 2.000000e+00 : f32
    %24 = vector.broadcast %cst_9 : f32 to vector<1x256xf32>
    %25 = arith.mulf %24, %9 : vector<1x256xf32>
    %cst_10 = arith.constant 1.500000e+01 : f32
    %26 = vector.broadcast %cst_10 : f32 to vector<1x256xf32>
    %27 = arith.divf %25, %26 : vector<1x256xf32>
    %cst_11 = arith.constant 1.000000e+00 : f32
    %28 = vector.broadcast %cst_11 : f32 to vector<1x256xf32>
    %29 = arith.subf %27, %28 : vector<1x256xf32>
    %30 = arith.addf %29, %16 : vector<1x256xf32>
    %cst_12 = arith.constant 1.000000e+00 : f32
    %31 = vector.broadcast %cst_12 : f32 to vector<1x256xf32>
    %32 = arith.addf %23, %31 : vector<1x256xf32>
    %cst_13 = arith.constant 1.600000e+01 : f32
    %33 = vector.broadcast %cst_13 : f32 to vector<1x256xf32>
    %34 = arith.mulf %32, %33 : vector<1x256xf32>
    %cst_14 = arith.constant 1.000000e+00 : f32
    %35 = vector.broadcast %cst_14 : f32 to vector<1x256xf32>
    %36 = arith.subf %34, %35 : vector<1x256xf32>
    %cst_15 = arith.constant 5.000000e-01 : f32
    %37 = vector.broadcast %cst_15 : f32 to vector<1x256xf32>
    %38 = arith.mulf %36, %37 : vector<1x256xf32>
    %cst_16 = arith.constant 0.000000e+00 : f32
    %cst_17 = arith.constant 1.500000e+01 : f32
    %39 = vector.broadcast %cst_16 : f32 to vector<1x256xf32>
    %40 = arith.maximumf %39, %38 : vector<1x256xf32>
    %41 = vector.broadcast %cst_17 : f32 to vector<1x256xf32>
    %42 = arith.minimumf %41, %40 : vector<1x256xf32>
    %cst_18 = arith.constant 1.000000e+00 : f32
    %43 = vector.broadcast %cst_18 : f32 to vector<1x256xf32>
    %44 = arith.addf %30, %43 : vector<1x256xf32>
    %cst_19 = arith.constant 1.600000e+01 : f32
    %45 = vector.broadcast %cst_19 : f32 to vector<1x256xf32>
    %46 = arith.mulf %44, %45 : vector<1x256xf32>
    %cst_20 = arith.constant 1.000000e+00 : f32
    %47 = vector.broadcast %cst_20 : f32 to vector<1x256xf32>
    %48 = arith.subf %46, %47 : vector<1x256xf32>
    %cst_21 = arith.constant 5.000000e-01 : f32
    %49 = vector.broadcast %cst_21 : f32 to vector<1x256xf32>
    %50 = arith.mulf %48, %49 : vector<1x256xf32>
    %cst_22 = arith.constant 0.000000e+00 : f32
    %cst_23 = arith.constant 1.500000e+01 : f32
    %51 = vector.broadcast %cst_22 : f32 to vector<1x256xf32>
    %52 = arith.maximumf %51, %50 : vector<1x256xf32>
    %53 = vector.broadcast %cst_23 : f32 to vector<1x256xf32>
    %54 = arith.minimumf %53, %52 : vector<1x256xf32>
    %55 = math.floor %42 : vector<1x256xf32>
    %56 = math.floor %54 : vector<1x256xf32>
    %57 = arith.subf %42, %55 : vector<1x256xf32>
    %58 = arith.subf %54, %56 : vector<1x256xf32>
    %59 = arith.fptosi %55 : vector<1x256xf32> to vector<1x256xi32>
    %60 = arith.fptosi %56 : vector<1x256xf32> to vector<1x256xi32>
    %c1_i32 = arith.constant 1 : i32
    %61 = vector.broadcast %c1_i32 : i32 to vector<1x256xi32>
    %62 = arith.addi %59, %61 : vector<1x256xi32>
    %c15_i32 = arith.constant 15 : i32
    %63 = vector.broadcast %c15_i32 : i32 to vector<1x256xi32>
    %64 = arith.minsi %62, %63 : vector<1x256xi32>
    %c1_i32_24 = arith.constant 1 : i32
    %65 = vector.broadcast %c1_i32_24 : i32 to vector<1x256xi32>
    %66 = arith.addi %60, %65 : vector<1x256xi32>
    %c15_i32_25 = arith.constant 15 : i32
    %67 = vector.broadcast %c15_i32_25 : i32 to vector<1x256xi32>
    %68 = arith.minsi %66, %67 : vector<1x256xi32>
    %69 = tpu.iota {dimensions = array<i32: 0>} : vector<16x256xi32>
    %70 = vector.broadcast %59 : vector<1x256xi32> to vector<16x256xi32>
    %71 = arith.cmpi eq, %69, %70 : vector<16x256xi32>
    %cst_26 = arith.constant 1.000000e+00 : f32
    %72 = vector.broadcast %cst_26 : f32 to vector<1x256xf32>
    %73 = arith.subf %72, %57 : vector<1x256xf32>
    %cst_27 = arith.constant 0.000000e+00 : f32
    %74 = vector.shape_cast %73 : vector<1x256xf32> to vector<1x256xf32>
    %75 = vector.broadcast %74 : vector<1x256xf32> to vector<16x256xf32>
    %76 = vector.broadcast %cst_27 : f32 to vector<16x256xf32>
    %77 = arith.select %71, %75, %76 : vector<16x256xi1>, vector<16x256xf32>
    %78 = vector.broadcast %64 : vector<1x256xi32> to vector<16x256xi32>
    %79 = arith.cmpi eq, %69, %78 : vector<16x256xi32>
    %cst_28 = arith.constant 0.000000e+00 : f32
    %80 = vector.shape_cast %57 : vector<1x256xf32> to vector<1x256xf32>
    %81 = vector.broadcast %80 : vector<1x256xf32> to vector<16x256xf32>
    %82 = vector.broadcast %cst_28 : f32 to vector<16x256xf32>
    %83 = arith.select %79, %81, %82 : vector<16x256xi1>, vector<16x256xf32>
    %84 = arith.addf %77, %83 : vector<16x256xf32>
    %85 = arith.truncf %84 : vector<16x256xf32> to vector<16x256xbf16>
    %86 = tpu.iota {dimensions = array<i32: 0>} : vector<16x256xi32>
    %87 = vector.broadcast %60 : vector<1x256xi32> to vector<16x256xi32>
    %88 = arith.cmpi eq, %86, %87 : vector<16x256xi32>
    %cst_29 = arith.constant 1.000000e+00 : f32
    %89 = vector.broadcast %cst_29 : f32 to vector<1x256xf32>
    %90 = arith.subf %89, %58 : vector<1x256xf32>
    %cst_30 = arith.constant 0.000000e+00 : f32
    %91 = vector.shape_cast %90 : vector<1x256xf32> to vector<1x256xf32>
    %92 = vector.broadcast %91 : vector<1x256xf32> to vector<16x256xf32>
    %93 = vector.broadcast %cst_30 : f32 to vector<16x256xf32>
    %94 = arith.select %88, %92, %93 : vector<16x256xi1>, vector<16x256xf32>
    %95 = vector.broadcast %68 : vector<1x256xi32> to vector<16x256xi32>
    %96 = arith.cmpi eq, %86, %95 : vector<16x256xi32>
    %cst_31 = arith.constant 0.000000e+00 : f32
    %97 = vector.shape_cast %58 : vector<1x256xf32> to vector<1x256xf32>
    %98 = vector.broadcast %97 : vector<1x256xf32> to vector<16x256xf32>
    %99 = vector.broadcast %cst_31 : f32 to vector<16x256xf32>
    %100 = arith.select %96, %98, %99 : vector<16x256xi1>, vector<16x256xf32>
    %101 = arith.addf %94, %100 : vector<16x256xf32>
    %c0_32 = arith.constant 0 : index
    %c0_33 = arith.constant 0 : index
    %c0_34 = arith.constant 0 : index
    %c0_35 = arith.constant 0 : index
    %102 = vector.load %arg2[%c0_32, %c0_33, %c0_34, %c0_35] : memref<1x3x16x16xbf16, #tpu.memory_space<vmem>>, vector<1x1x16x16xbf16>
    %103 = vector.shape_cast %102 : vector<1x1x16x16xbf16> to vector<16x16xbf16>
    %cst_36 = arith.constant dense<0.000000e+00> : vector<16x256xf32>
    %104 = tpu.matmul %103, %85, %cst_36 {dimension_numbers = #tpu.dot_dimension_numbers<[1], [0], [0], [1], [0, 0, 1, 1], [], []>} : vector<16x16xbf16>, vector<16x256xbf16>, vector<16x256xf32> -> vector<16x256xf32>
    %105 = arith.mulf %104, %101 : vector<16x256xf32>
    %cst_37 = arith.constant dense<0.000000e+00> : vector<256xf32>
    %106 = vector.multi_reduction <add>, %105, %cst_37 [0] : vector<16x256xf32> to vector<256xf32>
    %107 = vector.shape_cast %106 : vector<256xf32> to vector<1x256xf32>
    %c0_38 = arith.constant 0 : index
    %c1_39 = arith.constant 1 : index
    %c0_40 = arith.constant 0 : index
    %c0_41 = arith.constant 0 : index
    %108 = vector.load %arg2[%c0_38, %c1_39, %c0_40, %c0_41] : memref<1x3x16x16xbf16, #tpu.memory_space<vmem>>, vector<1x1x16x16xbf16>
    %109 = vector.shape_cast %108 : vector<1x1x16x16xbf16> to vector<16x16xbf16>
    %cst_42 = arith.constant dense<0.000000e+00> : vector<16x256xf32>
    %110 = tpu.matmul %109, %85, %cst_42 {dimension_numbers = #tpu.dot_dimension_numbers<[1], [0], [0], [1], [0, 0, 1, 1], [], []>} : vector<16x16xbf16>, vector<16x256xbf16>, vector<16x256xf32> -> vector<16x256xf32>
    %111 = arith.mulf %110, %101 : vector<16x256xf32>
    %cst_43 = arith.constant dense<0.000000e+00> : vector<256xf32>
    %112 = vector.multi_reduction <add>, %111, %cst_43 [0] : vector<16x256xf32> to vector<256xf32>
    %113 = vector.shape_cast %112 : vector<256xf32> to vector<1x256xf32>
    %c0_44 = arith.constant 0 : index
    %c2 = arith.constant 2 : index
    %c0_45 = arith.constant 0 : index
    %c0_46 = arith.constant 0 : index
    %114 = vector.load %arg2[%c0_44, %c2, %c0_45, %c0_46] : memref<1x3x16x16xbf16, #tpu.memory_space<vmem>>, vector<1x1x16x16xbf16>
    %115 = vector.shape_cast %114 : vector<1x1x16x16xbf16> to vector<16x16xbf16>
    %cst_47 = arith.constant dense<0.000000e+00> : vector<16x256xf32>
    %116 = tpu.matmul %115, %85, %cst_47 {dimension_numbers = #tpu.dot_dimension_numbers<[1], [0], [0], [1], [0, 0, 1, 1], [], []>} : vector<16x16xbf16>, vector<16x256xbf16>, vector<16x256xf32> -> vector<16x256xf32>
    %117 = arith.mulf %116, %101 : vector<16x256xf32>
    %cst_48 = arith.constant dense<0.000000e+00> : vector<256xf32>
    %118 = vector.multi_reduction <add>, %117, %cst_48 [0] : vector<16x256xf32> to vector<256xf32>
    %119 = vector.shape_cast %118 : vector<256xf32> to vector<1x256xf32>
    %120 = tpu.concatenate %107, %113, %119 in 0 : vector<1x256xf32>, vector<1x256xf32>, vector<1x256xf32> -> vector<3x256xf32>
    %c0_49 = arith.constant 0 : index
    %c0_50 = arith.constant 0 : index
    %c0_51 = arith.constant 0 : index
    %121 = vector.load %arg4[%c0_49, %c0_50, %c0_51] : memref<1x3x256xf32, #tpu.memory_space<vmem>>, vector<1x3x256xf32>
    %122 = vector.shape_cast %121 : vector<1x3x256xf32> to vector<3x256xf32>
    %123 = vector.shape_cast %120 : vector<3x256xf32> to vector<1x3x256xf32>
    tpu.vector_store %arg4[%c0_49, %c0_50, %c0_51], %123 {strides = array<i32>} : memref<1x3x256xf32, #tpu.memory_space<vmem>>, vector<1x3x256xf32>,
    return
  }
  func.func @transform_0(%arg0: i32, %arg1: i32) -> (i32, i32, i32, i32) {
    %c0_i32 = arith.constant 0 : i32
    %c0_i32_0 = arith.constant 0 : i32
    %c0_i32_1 = arith.constant 0 : i32
    %c0_i32_2 = arith.constant 0 : i32
    return %arg0, %c0_i32, %c0_i32_0, %c0_i32_1 : i32, i32, i32, i32
  }
  func.func @transform_1(%arg0: i32, %arg1: i32) -> (i32, i32, i32) {
    %c0_i32 = arith.constant 0 : i32
    %c0_i32_0 = arith.constant 0 : i32
    return %arg0, %c0_i32, %arg1 : i32, i32, i32
  }
  func.func @transform_2(%arg0: i32, %arg1: i32) -> (i32, i32, i32) {
    %c0_i32 = arith.constant 0 : i32
    %c0_i32_0 = arith.constant 0 : i32
    return %arg0, %c0_i32, %arg1 : i32, i32, i32
  }
}

</mosaic_0001>

<bundles_post_ra>
// kernel: autotoon_forward.4
= control target key start
LH: loop header
LB: loop body
LE: loop exit
PB: predicated region body
PF: predicated region fallthrough
CT: control target
= control target key end

     0   :  { %vm35_vm0 = vcmask 1041408   ;;  %vm32_vm1 = vcmask 31744   ;;  %vm90_vm2 = vcmask 130048   ;;  %s253_s2 = inlined_call_operand.vmem [shape: bf16[4,16], index: 2, kind: input, shape index: {}]   ;;  %s254_s0 = inlined_call_operand.vmem [shape: bf16[4,4,4], index: 0, kind: input, shape index: {}]   ;;  %s255_s1 = inlined_call_operand.vmem [shape: bf16[16,4], index: 1, kind: input, shape index: {}]   ;;  %s256_s3 = inlined_call_operand.vmem [shape: f32[4,16,16], index: 3, kind: output, shape index: {}]  }
   0x1   :  { %v19_v0 = vld [vmem:[%s253_s2] sm:$0x3]  ;;  %v16_v2 = vld [vmem:[%s254_s0 + $0x2] sm:$0x3]  ;;  %v17_v4 = vld [vmem:[%s254_s0 + $0x4] sm:$0x3] }
   0x2   :  { %v15_v1 = vld [vmem:[%s254_s0] sm:$0x3]  ;;  %v37_v3 = vsel %vm35_vm0, %v19_v0, 0  ;;  %v18_v5 = vld [vmem:[%s254_s0 + $0x6] sm:$0x3] }
   0x3   :  { %46 = vmatpush.bf16.msra.mxu0 %v37_v3  ;;  %21 = vst [vmem:[#allocation1] ss:$4 sm:$0xff] %v15_v1  ;;  %v172_v13 = vld [vmem:[%s255_s1] sm:$0xff] }
   0x4   :  { %24 = vst [vmem:[#allocation1 + $0x1] ss:$4 sm:$0xff] %v16_v2 }
   0x5   :  { %27 = vst [vmem:[#allocation1 + $0x2] ss:$4 sm:$0xff] %v17_v4 }
   0x6   :  { %30 = vst [vmem:[#allocation1 + $0x3] ss:$4 sm:$0xff] %v18_v5 }
   0xd   :  { %v31_v6 = vld.sshfl [vmem:[#allocation1] sm:$0xff pattern:$0x73625140] }
   0xe   :  { %157 = vmatmul.msk.bf16.vlgmr.msra.gmra.mxu0 %vm32_vm1, %v31_v6 }
  0x8b   :  { %v48_v7 = vpop.f32.mrf.mxu0 }
  0x8c   :  { %v55_v8 = vrot.slane %v48_v7, 4  ;;  %v59_v9 = vpack.c.bf16 %v48_v7, %v48_v7 }
  0x8e   :  { %v74_v10 = vsel %vm35_vm0, %v59_v9, 0  ;;  %v60_v11 = vpack.c.bf16 %v55_v8, %v55_v8 }
  0x8f   :  { %83 = vmatpush.bf16.msra.mxu1 %v74_v10 }
  0x90   :  { %v94_v12 = vsel %vm35_vm0, %v60_v11, 0 }
  0x91   :  { %103 = vmatpush.bf16.msra.mxu2 %v94_v12 }
  0x92   :  { %162 = vmatmul.msk.bf16.vlgmr.msra.gmra.mxu1 %vm32_vm1, %v172_v13 }
  0x93   :  { %v50_v14 = vpop.f32.mrf.mxu0 }
  0x94   :  { %v56_v15 = vrot.slane %v50_v14, 4  ;;  %v61_v16 = vpack.c.bf16 %v50_v14, %v50_v14  ;;  %163 = vmatmul.msk.bf16.vlgmr.msra.gmra.mxu2 %vm32_vm1, %v172_v13 }
  0x96   :  { %v62_v17 = vpack.c.bf16 %v56_v15, %v56_v15  ;;  %v114_v18 = vsel %vm35_vm0, %v61_v16, 0 }
  0x97   :  { %123 = vmatpush.bf16.msra.mxu3 %v114_v18 }
  0x98   :  { %v134_v19 = vsel %vm35_vm0, %v62_v17, 0 }
  0x99   :  { %143 = vmatpush.bf16.msrb.mxu0 %v134_v19 }
  0x9a   :  { %166 = vmatmul.msk.bf16.vlgmr.msra.gmra.mxu3 %vm32_vm1, %v172_v13 }
  0x9c   :  { %169 = vmatmul.msk.bf16.vlgmr.msrb.gmra.mxu0 %vm32_vm1, %v172_v13 }
 0x10f   :  { %v85_v20 = vpop.f32.mrf.mxu1 }
 0x110   :  { %91 = vst.msk [vmem:[%s256_s3] sm:$0xff] %vm90_vm2, %v85_v20 }
 0x117   :  { %v105_v21 = vpop.f32.mrf.mxu2  ;;  %v87_v22 = vpop.f32.mrf.mxu1 }
 0x118   :  { %164 = vst.msk [vmem:[%s256_s3 + $0x10] sm:$0xff] %vm90_vm2, %v105_v21 }
 0x119   :  { %v145_v23 = vpop.f32.mrf.mxu0  ;;  %92 = vst.msk [vmem:[%s256_s3 + $0x8] sm:$0xff] %vm90_vm2, %v87_v22 }
 0x11a   :  { %170 = vst.msk [vmem:[%s256_s3 + $0x30] sm:$0xff] %vm90_vm2, %v145_v23 }
 0x11d   :  { %v125_v24 = vpop.f32.mrf.mxu3 }
 0x11e   :  { %167 = vst.msk [vmem:[%s256_s3 + $0x20] sm:$0xff] %vm90_vm2, %v125_v24 }
 0x11f   :  { %v107_v25 = vpop.f32.mrf.mxu2 }
 0x120   :  { %165 = vst.msk [vmem:[%s256_s3 + $0x18] sm:$0xff] %vm90_vm2, %v107_v25 }
 0x121   :  { %v147_v26 = vpop.f32.mrf.mxu0 }
 0x122   :  { %171 = vst.msk [vmem:[%s256_s3 + $0x38] sm:$0xff] %vm90_vm2, %v147_v26 }
 0x125   :  { %v127_v27 = vpop.f32.mrf.mxu3 }
 0x126   :  { %168 = vst.msk [vmem:[%s256_s3 + $0x28] sm:$0xff] %vm90_vm2, %v127_v27 }

// kernel: autotoon_forward.3
= control target key start
LH: loop header
LB: loop body
LE: loop exit
PB: predicated region body
PF: predicated region fallthrough
CT: control target
= control target key end

     0   :  { %v88_v1 = vmov 0   ;;  %vm46_vm0 = vcmask 392192   ;;  %vm64_vm1 = vcmask 254976   ;;  %s127_s2 = inlined_call_operand.vmem [shape: bf16[48,32], index: 2, kind: input, shape index: {}]   ;;  %s128_s1 = inlined_call_operand.vmem [shape: f32[2,1], index: 1, kind: input, shape index: {}]   ;;  %s129_s0 = inlined_call_operand.vmem [shape: bf16[2,48], index: 0, kind: input, shape index: {}]   ;;  %s130_s3 = inlined_call_operand.vmem [shape: f32[2,32], index: 3, kind: output, shape index: {}]  }
   0x1   :  { %v85_v0 = vld [vmem:[%s127_s2 + $0x10] sm:$0xff]  ;;  %87 = vset.pattern.permute.xlu0 %v88_v1  ;;  %v22_v2 = vld [vmem:[%s128_s1] sm:$0x3]  ;;  %v84_v3 = vld [vmem:[%s127_s2 + $0x8] sm:$0xff] }
   0x2   :  { %55 = vmatpush.bf16.msra.mxu0 %v85_v0  ;;  %25 = vperm.xlu0 %87, %v22_v2   ;;  %v83_v4 = vld [vmem:[%s127_s2] sm:$0xff] }
   0x3   :  { %v15_v5 = vld [vmem:[%s129_s0] sm:$0x1] }
   0x6   :  { %56 = vmatpush.bf16.msra.mxu0 %v84_v3 }
   0xa   :  { %57 = vmatpush.bf16.msra.mxu0 %v83_v4 }
   0xd   :  { %82 = vmatmul.msk.bf16.vlgmr.msra.gmra.mxu0 %vm46_vm0, %v15_v5 }
  0x74   :  { %v26_v6 = vpop.permute.xlu0 %25 }
  0x8a   :  { %v59_v7 = vpop.f32.mrf.mxu0 }
  0x8b   :  { %v60_v8 = vadd.f32 %v59_v7, %v26_v6 }
  0x8d   :  { %v63_v9 = vmul.f32 0.01, %v60_v8 }
  0x8f   :  { %65 = vst.msk [vmem:[%s130_s3] sm:$0x3] %vm64_vm1, %v63_v9 }
  0x92   :  { %v61_v10 = vpop.f32.mrf.mxu0 }

// kernel: autotoon_forward.5
= control target key start
LH: loop header
LB: loop body
LE: loop exit
PB: predicated region body
PF: predicated region fallthrough
CT: control target
= control target key end

     0   :  { %s790_s9 = smov 0   ;;  %s792_s10 = smov 0   ;;  %s928_s0 = inlined_call_operand.vmem [shape: bf16[2,3,16,16], index: 0, kind: input, shape index: {}]   ;;  %s929_s1 = inlined_call_operand.vmem [shape: f32[2,2,256], index: 1, kind: input, shape index: {}]   ;;  %s930_s2 = inlined_call_operand.vmem [shape: f32[2,3,256], index: 2, kind: output, shape index: {}]  }
   0x1   :  { %s794_s11 = smov 0  }
   0x2 LB: > { %s24_s12 = sadd.s32 1, %s767_s10  ;;  %p666_p0 = scmp.ge.s32.totalorder %s771_s11, 1  ;;  %s771_s11 = sphi %s794_s11, %s12_s11   ;;  %s767_s10 = sphi %s792_s10, %s948_s10   ;;  %s763_s9 = sphi %s790_s9, %s947_s9  }
   0x3   : > { %p26_p1 = scmp.ge.s32.totalorder %s24_s12, 2  ;;  %p143_p2 = scmp.lt.s32.totalorder %s771_s11, 3 }
   0x5   : > { %s950_s12 = smov (%p26_p1, %s24_s12), 0  ;;  %p144_p3 = pnand %p666_p0, %p143_p2 }
   0x6   : > { %p178_p4 = scmp.lt.s32.totalorder (!%p144_p3), %s763_s9, 1 }
   0x7   : > { %147 = sbr.rel (%p144_p3) target bundleno = 249 (0xf9), region = 28 }
   0xc   : > { %v205_v0 = vlaneseq  ;;  %v773_v1 = vmov 16.0   ;;  %v774_v3 = vmov 15.0   ;;  %s952_s9 = smov (!%p178_p4, %s763_s9), 1  ;;  %vm386_vm12 = vcmask 130048  }
   0xd   : > { %745 = vrcp.f32 %v773_v1  ;;  %s705_s13 = sshll.u32 %s952_s9, 2  ;;  %s710_s17 = smul.u32 24, %s952_s9 }
   0xe   : > { %v206_v2 = vand.u32 127, %v205_v0  ;;  %747 = vrcp.f32 %v774_v3  ;;  %s824_s16 = scalar_lea.vmem %s929_s1, %s705_s13  ;;  %v835_v50 = vshrl.u32 %v205_v0, 7  ;;  %s706_s21 = sshll.u32 %s952_s9, 3 }
   0xf   : > { %v230_v28 = vld [vmem:[%s824_s16] ss:$2 sm:$0x3]  ;;  %s182_s20 = scalar_lea.vmem %s928_s0, %s710_s17  ;;  %s201_s24 = scalar_lea.vmem %s930_s2, %s706_s21 }
  0x10   : > { %v207_v4 = vadd.s32 128, %v206_v2  ;;  %v211_v8 = vcvt.s32.f32 %v206_v2  ;;  %v247_v33 = vperm.slane %v230_v28, 0  ;;  %v248_v35 = vperm.slane %v230_v28, 1 }
  0x11   : > { %v838_v55 = vadd.s32 8, %v835_v50 }
  0x12   : > { %v212_v10 = vcvt.s32.f32 %v207_v4  ;;  %v213_v14 = vadd.f32 0.5, %v211_v8 }
  0x13   : > { %v746_v5 = vpop.eup %745 }
  0x14   : > { %v748_v6 = vpop.eup %747  ;;  %v216_v7 = vmul.f32 16.0, %v746_v5  ;;  %vm220_vm0 = vweird.f32 %v746_v5  ;;  %v214_v15 = vadd.f32 0.5, %v212_v10 }
  0x15   : > { %v236_v9 = vmul.f32 15.0, %v748_v6  ;;  %vm240_vm1 = vweird.f32 %v748_v6 }
  0x16   : > { %v217_v11 = vsub.f32 1.0, %v216_v7 }
  0x17   : > { %v237_v13 = vsub.f32 1.0, %v236_v9 }
  0x18   : > { %v218_v12 = vmul.f32 %v746_v5, %v217_v11 }
  0x19   : > { %v238_v18 = vmul.f32 %v748_v6, %v237_v13 }
  0x1a   : > { %v219_v16 = vadd.f32 %v746_v5, %v218_v12 }
  0x1b   : > { %v239_v23 = vadd.f32 %v748_v6, %v238_v18 }
  0x1c   : > { %v221_v17 = vsel %vm220_vm0, %v746_v5, %v219_v16 }
  0x1d   : > { %v814_v19 = vmul.f32 %v221_v17, %v213_v14  ;;  %v816_v20 = vmul.f32 %v221_v17, %v214_v15  ;;  %v831_v29 = vsel %vm240_vm1, %v748_v6, %v239_v23 }
  0x1f   : > { %v224_v21 = vfloor.f32 %v814_v19  ;;  %v225_v22 = vfloor.f32 %v816_v20  ;;  %v672_v19 = vld [vmem:[%s824_s16 + $0x1] ss:$2 sm:$0x3] }
  0x21   : > { %v226_v24 = vmul.f32 16.0, %v224_v21  ;;  %v227_v25 = vmul.f32 16.0, %v225_v22  ;;  %v253_v16 = vmul.f32 2.0, %v224_v21 }
  0x23   : > { %v228_v26 = vsub.f32 %v211_v8, %v226_v24  ;;  %v229_v27 = vsub.f32 %v212_v10, %v227_v25  ;;  %v255_v28 = vmul.f32 %v253_v16, %v831_v29 }
  0x25   : > { %v233_v30 = vmul.f32 2.0, %v228_v26  ;;  %v234_v31 = vmul.f32 2.0, %v229_v27 }
  0x27   : > { %v242_v32 = vmul.f32 %v831_v29, %v233_v30  ;;  %v243_v34 = vmul.f32 %v831_v29, %v234_v31  ;;  %v260_v30 = vperm.slane %v672_v19, 0 }
  0x29   : > { %v673_v36 = vadd.f32 -1.0, %v242_v32  ;;  %v674_v37 = vadd.f32 -1.0, %v243_v34  ;;  %v707_v34 = vld [vmem:[%s182_s20] sm:$0xff] }
  0x2b   : > { %v251_v38 = vadd.f32 %v673_v36, %v247_v33  ;;  %v252_v39 = vadd.f32 %v674_v37, %v248_v35  ;;  %v708_v35 = vld [vmem:[%s182_s20 + $0x8] sm:$0xff]  ;;  %v675_v36 = vadd.f32 -1.0, %v255_v28 }
  0x2d   : > { %v266_v40 = vadd.f32 1.0, %v251_v38  ;;  %v267_v41 = vadd.f32 1.0, %v252_v39  ;;  %v264_v38 = vadd.f32 %v675_v36, %v260_v30  ;;  %v709_v39 = vld [vmem:[%s182_s20 + $0x10] sm:$0xff] }
  0x2f   : > { %v268_v42 = vmul.f32 16.0, %v266_v40  ;;  %v269_v43 = vmul.f32 16.0, %v267_v41  ;;  %v254_v40 = vmul.f32 2.0, %v225_v22 }
  0x31   : > { %v677_v44 = vadd.f32 -1.0, %v268_v42  ;;  %v678_v45 = vadd.f32 -1.0, %v269_v43  ;;  %v256_v41 = vmul.f32 %v254_v40, %v831_v29  ;;  %v261_v43 = vperm.slane %v672_v19, 1 }
  0x33   : > { %v272_v46 = vmul.f32 0.5, %v677_v44  ;;  %v273_v47 = vmul.f32 0.5, %v678_v45  ;;  %v676_v42 = vadd.f32 -1.0, %v256_v41 }
  0x35   : > { %v274_v48 = vmax.f32 %v272_v46, 0.0  ;;  %v275_v49 = vmax.f32 %v273_v47, 0.0  ;;  %v265_v44 = vadd.f32 %v676_v42, %v261_v43  ;;  %v278_v46 = vadd.f32 1.0, %v264_v38 }
  0x37   : > { %v276_v51 = vmin.f32 %v274_v48, 15.0  ;;  %v277_v52 = vmin.f32 %v275_v49, 15.0  ;;  %v279_v45 = vadd.f32 1.0, %v265_v44  ;;  %v280_v48 = vmul.f32 16.0, %v278_v46 }
  0x39   : > { %v290_v53 = vfloor.f32 %v276_v51  ;;  %v291_v54 = vfloor.f32 %v277_v52  ;;  %v281_v47 = vmul.f32 16.0, %v279_v45 }
  0x3b   : > { %v294_v56 = vsub.f32 %v276_v51, %v290_v53  ;;  %v712_v57 = vcvt.f32.s32 %v290_v53  ;;  %v295_v58 = vsub.f32 %v277_v52, %v291_v54  ;;  %v714_v59 = vcvt.f32.s32 %v291_v54 }
  0x3c   : > { %v680_v49 = vadd.f32 -1.0, %v281_v47  ;;  %v679_v51 = vadd.f32 -1.0, %v280_v48 }
  0x3d   : > { %v302_v60 = vadd.s32 1, %v712_v57  ;;  %v317_v61 = vperm.slane %v712_v57, 0  ;;  %v323_v62 = vsub.f32 1.0, %v294_v56  ;;  %v337_v63 = vperm.slane %v294_v56, 0 }
  0x3e   : > { %v303_v1 = vadd.s32 1, %v714_v59  ;;  %v318_v2 = vperm.slane %v714_v59, 0  ;;  %v324_v0 = vsub.f32 1.0, %v295_v58  ;;  %v338_v8 = vperm.slane %v295_v58, 0 }
  0x3f   : > { %vm304_vm2 = vcmp.lt.s32.totalorder %v302_v60, 15  ;;  %vm841_vm3 = vcmp.eq.s32.totalorder %v835_v50, %v317_v61  ;;  %vm846_vm4 = vcmp.eq.s32.totalorder %v838_v55, %v317_v61  ;;  %v325_v5 = vperm.slane %v323_v62, 0 }
  0x40   : > { %v305_v6 = vsel %vm304_vm2, %v302_v60, 15  ;;  %vm306_vm5 = vcmp.lt.s32.totalorder %v303_v1, 15  ;;  %vm851_vm6 = vcmp.eq.s32.totalorder %v835_v50, %v318_v2  ;;  %vm858_vm7 = vcmp.eq.s32.totalorder %v838_v55, %v318_v2 }
  0x41   : > { %v327_v9 = vsel %vm841_vm3, %v325_v5, 0.0  ;;  %v331_v10 = vperm.slane %v305_v6, 0  ;;  %v307_v11 = vsel %vm306_vm5, %v303_v1, 15  ;;  %v329_v13 = vsel %vm846_vm4, %v325_v5, 0.0 }
  0x42   : > { %v326_v14 = vperm.slane %v324_v0, 0  ;;  %v332_v15 = vperm.slane %v307_v11, 0  ;;  %v285_v52 = vmul.f32 0.5, %v680_v49  ;;  %v284_v53 = vmul.f32 0.5, %v679_v51 }
  0x43   : > { %vm333_vm8 = vcmp.eq.s32.totalorder %v835_v50, %v331_v10  ;;  %vm335_vm9 = vcmp.eq.s32.totalorder %v838_v55, %v331_v10 }
  0x44   : > { %v339_v17 = vsel %vm333_vm8, %v337_v63, 0.0  ;;  %v341_v18 = vsel %vm335_vm9, %v337_v63, 0.0  ;;  %v328_v23 = vsel %vm851_vm6, %v326_v14, 0.0  ;;  %v330_v24 = vsel %vm858_vm7, %v326_v14, 0.0 }
  0x45   : > { %v343_v25 = vadd.f32 %v339_v17, %v327_v9  ;;  %v345_v26 = vadd.f32 %v341_v18, %v329_v13  ;;  %vm334_vm10 = vcmp.eq.s32.totalorder %v835_v50, %v332_v15  ;;  %vm336_vm11 = vcmp.eq.s32.totalorder %v838_v55, %v332_v15 }
  0x46   : > { %v340_v21 = vsel %vm334_vm10, %v338_v8, 0.0  ;;  %v342_v27 = vsel %vm336_vm11, %v338_v8, 0.0  ;;  %v287_v54 = vmax.f32 %v285_v52, 0.0  ;;  %v286_v56 = vmax.f32 %v284_v53, 0.0 }
  0x47   : > { %v347_v31 = vpack.c.bf16 %v345_v26, %v343_v25  ;;  %v344_v32 = vadd.f32 %v340_v21, %v328_v23  ;;  %v346_v33 = vadd.f32 %v342_v27, %v330_v24  ;;  %vm550_vm7 = vcmask 1040384  }
  0x48   : > { %v289_v57 = vmin.f32 %v287_v54, 15.0  ;;  %v288_v58 = vmin.f32 %v286_v56, 15.0  ;;  %vm553_vm8 = vcmask 1041408   ;;  %vm559_vm9 = vcmask 1043456  }
  0x49   : > { %397 = vmatpush.bf16.msra.mxu0 %v347_v31  ;;  %v348_v37 = vpack.c.bf16 %v346_v33, %v344_v32  ;;  %454 = vmatpush.bf16.msra.mxu2 %v347_v31 }
  0x4a   : > { %v293_v59 = vfloor.f32 %v289_v57  ;;  %v292_v20 = vfloor.f32 %v288_v58 }
  0x4b   : > { %411 = vmatpush.bf16.msra.mxu1 %v348_v37  ;;  %468 = vmatpush.bf16.msra.mxu3 %v348_v37 }
  0x4c   : > { %685 = vmatmul.msk.bf16.vlgmr.msra.gmra.mxu0 %vm386_vm12, %v707_v34  ;;  %693 = vmatmul.msk.bf16.vlgmr.msra.gmra.mxu2 %vm386_vm12, %v708_v35  ;;  %v718_v22 = vcvt.f32.s32 %v293_v59  ;;  %v716_v60 = vcvt.f32.s32 %v292_v20  ;;  %v296_v62 = vsub.f32 %v288_v58, %v292_v20  ;;  %v297_v63 = vsub.f32 %v289_v57, %v293_v59 }
  0x4d   : > { %511 = vmatpush.bf16.msrb.mxu0 %v347_v31 }
  0x4e   : > { %686 = vmatmul.msk.bf16.vlgmr.msra.gmra.mxu1 %vm386_vm12, %v707_v34  ;;  %694 = vmatmul.msk.bf16.vlgmr.msra.gmra.mxu3 %vm386_vm12, %v708_v35  ;;  %v309_v29 = vadd.s32 1, %v718_v22  ;;  %v308_v61 = vadd.s32 1, %v716_v60  ;;  %v355_v0 = vsub.f32 1.0, %v296_v62  ;;  %v356_v3 = vsub.f32 1.0, %v297_v63 }
  0x4f   : > { %525 = vmatpush.bf16.msrb.mxu1 %v348_v37  ;;  %v350_v5 = vperm.slane %v718_v22, 0  ;;  %v349_v7 = vperm.slane %v716_v60, 0  ;;  %v369_v12 = vperm.slane %v296_v62, 0  ;;  %v370_v14 = vperm.slane %v297_v63, 0 }
  0x50   : > { %vm312_vm13 = vcmp.lt.s32.totalorder %v309_v29, 15  ;;  %vm310_vm14 = vcmp.lt.s32.totalorder %v308_v61, 15  ;;  %v357_v11 = vperm.slane %v355_v0, 0  ;;  %v358_v13 = vperm.slane %v356_v3, 0 }
  0x51   : > { %v313_v1 = vsel %vm312_vm13, %v309_v29, 15  ;;  %v311_v2 = vsel %vm310_vm14, %v308_v61, 15  ;;  %vm884_vm15 = vcmp.eq.s32.totalorder %v838_v55, %v350_v5  ;;  %vm890_vm1 = vcmp.eq.s32.totalorder %v835_v50, %v350_v5 }
  0x52   : > { %v364_v6 = vperm.slane %v313_v1, 0  ;;  %v363_v8 = vperm.slane %v311_v2, 0  ;;  %vm896_vm3 = vcmp.eq.s32.totalorder %v838_v55, %v349_v7  ;;  %vm902_vm5 = vcmp.eq.s32.totalorder %v835_v50, %v349_v7 }
  0x53   : > { %v362_v18 = vsel %vm884_vm15, %v358_v13, 0.0  ;;  %v360_v25 = vsel %vm890_vm1, %v358_v13, 0.0  ;;  %v361_v19 = vsel %vm896_vm3, %v357_v11, 0.0  ;;  %v359_v21 = vsel %vm902_vm5, %v357_v11, 0.0 }
  0x54   : > { %vm368_vm0 = vcmp.eq.s32.totalorder %v838_v55, %v364_v6  ;;  %vm366_vm2 = vcmp.eq.s32.totalorder %v835_v50, %v364_v6  ;;  %vm367_vm4 = vcmp.eq.s32.totalorder %v838_v55, %v363_v8  ;;  %vm365_vm6 = vcmp.eq.s32.totalorder %v835_v50, %v363_v8 }
  0x55   : > { %v374_v23 = vsel %vm368_vm0, %v370_v14, 0.0  ;;  %v372_v26 = vsel %vm366_vm2, %v370_v14, 0.0  ;;  %v373_v55 = vsel %vm367_vm4, %v369_v12, 0.0  ;;  %v371_v27 = vsel %vm365_vm6, %v369_v12, 0.0 }
  0x56   : > { %v378_v50 = vadd.f32 %v374_v23, %v362_v18  ;;  %v376_v31 = vadd.f32 %v372_v26, %v360_v25  ;;  %v377_v32 = vadd.f32 %v373_v55, %v361_v19  ;;  %v375_v34 = vadd.f32 %v371_v27, %v359_v21 }
  0x5c   : > { %701 = vmatmul.msk.bf16.vlgmr.msrb.gmra.mxu0 %vm386_vm12, %v709_v39 }
  0x5e   : > { %702 = vmatmul.msk.bf16.vlgmr.msrb.gmra.mxu1 %vm386_vm12, %v709_v39 }
  0xc9   : > { %v399_v4 = vpop.f32.mrf.mxu0 }
  0xca   : > { %v418_v42 = vmul.f32 %v399_v4, %v375_v34 }
  0xcb   : > { %v413_v9 = vpop.f32.mrf.mxu1 }
  0xcc   : > { %v419_v37 = vmul.f32 %v413_v9, %v376_v31 }
  0xcf   : > { %v456_v24 = vpop.f32.mrf.mxu2 }
  0xd0   : > { %v475_v36 = vmul.f32 %v456_v24, %v375_v34 }
  0xd1   : > { %v470_v28 = vpop.f32.mrf.mxu3  ;;  %v401_v30 = vpop.f32.mrf.mxu0 }
  0xd2   : > { %v420_v38 = vmul.f32 %v401_v30, %v377_v32  ;;  %v476_v40 = vmul.f32 %v470_v28, %v376_v31 }
  0xd3   : > { %v415_v33 = vpop.f32.mrf.mxu1 }
  0xd4   : > { %v421_v35 = vmul.f32 %v415_v33, %v378_v50  ;;  %v422_v48 = vadd.f32 %v420_v38, %v418_v42 }
  0xd6   : > { %v429_v43 = vadd.f32 %v421_v35, %v419_v37  ;;  %v423_v56 = vrot.slane %v422_v48, 4 }
  0xd7   : > { %v458_v39 = vpop.f32.mrf.mxu2 }
  0xd8   : > { %v477_v41 = vmul.f32 %v458_v39, %v377_v32  ;;  %v430_v52 = vrot.slane %v429_v43, 4  ;;  %v424_v29 = vadd.f32 %v423_v56, %v422_v48 }
  0xd9   : > { %v472_v44 = vpop.f32.mrf.mxu3  ;;  %v513_v45 = vpop.f32.mrf.mxu0 }
  0xda   : > { %v479_v46 = vadd.f32 %v477_v41, %v475_v36  ;;  %v478_v47 = vmul.f32 %v472_v44, %v378_v50  ;;  %v431_v58 = vadd.f32 %v430_v52, %v429_v43  ;;  %v532_v22 = vmul.f32 %v513_v45, %v375_v34 }
  0xdb   : > { %v527_v49 = vpop.f32.mrf.mxu1  ;;  %v425_v6 = vrot.slane %v424_v29, 2 }
  0xdc   : > { %v486_v51 = vadd.f32 %v478_v47, %v476_v40  ;;  %v480_v53 = vrot.slane %v479_v46, 4  ;;  %v533_v63 = vmul.f32 %v527_v49, %v376_v31  ;;  %v432_v0 = vrot.slane %v431_v58, 2 }
  0xdd   : > { %v426_v14 = vadd.f32 %v425_v6, %v424_v29 }
  0xde   : > { %v487_v54 = vrot.slane %v486_v51, 4  ;;  %v481_v59 = vadd.f32 %v480_v53, %v479_v46  ;;  %v433_v10 = vadd.f32 %v432_v0, %v431_v58 }
  0xdf   : > { %v427_v26 = vrot.slane %v426_v14, 1 }
  0xe0   : > { %v488_v57 = vadd.f32 %v487_v54, %v486_v51  ;;  %v482_v3 = vrot.slane %v481_v59, 2  ;;  %v434_v18 = vrot.slane %v433_v10, 1 }
  0xe1   : > { %v515_v20 = vpop.f32.mrf.mxu0 }
  0xe2   : > { %v534_v60 = vmul.f32 %v515_v20, %v377_v32  ;;  %v489_v61 = vrot.slane %v488_v57, 2  ;;  %v483_v11 = vadd.f32 %v482_v3, %v481_v59  ;;  %v435_v21 = vadd.f32 %v434_v18, %v433_v10 }
  0xe3   : > { %v529_v62 = vpop.f32.mrf.mxu1 }
  0xe4   : > { %v536_v1 = vadd.f32 %v534_v60, %v532_v22  ;;  %v535_v2 = vmul.f32 %v529_v62, %v378_v50  ;;  %v490_v7 = vadd.f32 %v489_v61, %v488_v57  ;;  %v484_v23 = vrot.slane %v483_v11, 1 }
  0xe5   : > { %v428_v50 = vadd.f32 %v427_v26, %v426_v14 }
  0xe6   : > { %v537_v4 = vrot.slane %v536_v1, 4  ;;  %v543_v5 = vadd.f32 %v535_v2, %v533_v63  ;;  %v491_v15 = vrot.slane %v490_v7, 1  ;;  %v485_v27 = vadd.f32 %v484_v23, %v483_v11 }
  0xe8   : > { %v538_v8 = vadd.f32 %v537_v4, %v536_v1  ;;  %v544_v9 = vrot.slane %v543_v5, 4  ;;  %v492_v19 = vadd.f32 %v491_v15, %v490_v7  ;;  %v551_v33 = vsel %vm550_vm7, %v428_v50, %v485_v27 }
  0xea   : > { %v539_v12 = vrot.slane %v538_v8, 2  ;;  %v545_v13 = vadd.f32 %v544_v9, %v543_v5  ;;  %v552_v31 = vsel %vm550_vm7, %v435_v21, %v492_v19 }
  0xec   : > { %v540_v16 = vadd.f32 %v539_v12, %v538_v8  ;;  %v546_v17 = vrot.slane %v545_v13, 2 }
  0xee   : > { %v541_v24 = vrot.slane %v540_v16, 1  ;;  %v547_v25 = vadd.f32 %v546_v17, %v545_v13 }
  0xf0   : > { %v548_v55 = vrot.slane %v547_v25, 1  ;;  %v542_v28 = vadd.f32 %v541_v24, %v540_v16 }
  0xf2   : > { %v549_v30 = vadd.f32 %v548_v55, %v547_v25  ;;  %v554_v35 = vsel %vm553_vm8, %v551_v33, %v542_v28 }
  0xf4   : > { %v555_v32 = vsel %vm553_vm8, %v552_v31, %v549_v30 }
  0xf5   : > { %v558_v34 = vrot.slane %v555_v32, 4 }
  0xf7   : > { %v560_v36 = vsel %vm559_vm9, %v554_v35, %v558_v34 }
  0xf8   : > { %562 = vst [vmem:[%s201_s24] sm:$0x77] %v560_v36 }
  0xf9 PF: > { %s12_s11 = sadd.s32 1, %s771_s11   ;;  %s947_s9 = smov %s767_s10 }
  0xfa   : > { %p9_p5 = scmp.ge.s32.totalorder %s12_s11, 4   ;;  %s948_s10 = smov %s950_s12 }
  0xfc   :  { %11 = sbr.rel (!%p9_p5) target bundleno = 2 (0x2), region = 64 }

</bundles_post_ra>
